<compile_context>
chip_gen: v6e
topology: v6e:2x2x1
jax: 0.10.0
libtpu: 0.0.40
codegen_flags: <defaults>
</compile_context>

<pallas_src>
import math

import jax
import jax.numpy as jnp
from jax.experimental import pallas as pl
from jax.experimental.pallas import tpu as pltpu


def _round_up(x, m):
    return ((x + m - 1) // m) * m


def _mlp_kernel(x_ref, w1_ref, b1_ref, w2_ref, b2_ref, w3_ref, b3_ref, o_ref):
    # Hoist bias loads once per tile (f32, shape (1, H) -> broadcasts over batch).
    b1 = b1_ref[...]
    b2 = b2_ref[...]
    b3 = b3_ref[...]

    # Cast the activation tile to the weight compute dtype (bf16) in-register;
    # x arrives unpadded / uncast so no extra HBM pass is needed outside.
    x = x_ref[...].astype(w1_ref.dtype)

    # Layer 1: Linear + ReLU  (bf16 operands, f32 accumulate)
    h = jnp.dot(x, w1_ref[...], preferred_element_type=jnp.float32)
    h = jnp.maximum(h + b1, 0.0)

    # Layer 2: Linear + ReLU
    h = jnp.dot(h.astype(w2_ref.dtype), w2_ref[...],
                preferred_element_type=jnp.float32)
    h = jnp.maximum(h + b2, 0.0)

    # Layer 3: Linear (no activation)
    h = jnp.dot(h.astype(w3_ref.dtype), w3_ref[...],
                preferred_element_type=jnp.float32)
    o_ref[...] = (h + b3).astype(o_ref.dtype)


def prepare_params(params, compute_dtype=jnp.bfloat16):
    """One-time prep: cast weights to the MXU compute dtype, biases to f32.
    Weights are stored (in_features, out_features), i.e. already transposed
    from PyTorch's (out, in) layout.  Call once and reuse across forwards."""
    return {
        "w1": params["w1"].astype(compute_dtype),
        "w2": params["w2"].astype(compute_dtype),
        "w3": params["w3"].astype(compute_dtype),
        "b1": params["b1"].astype(jnp.float32),
        "b2": params["b2"].astype(jnp.float32),
        "b3": params["b3"].astype(jnp.float32),
    }


def mlp_forward(x, prepared, *, block_b=2048):
    """x: (B, in_dim) float32.  prepared: output of prepare_params()."""
    B, in_dim = x.shape
    hid = prepared["w1"].shape[1]
    out_dim = prepared["w3"].shape[1]
    assert prepared["w1"].shape[0] == in_dim
    assert prepared["w2"].shape == (hid, hid)
    assert prepared["w3"].shape[0] == hid

    # Batch tile: multiple of 8 (sublane), large by default (HBM/overhead
    # bound kernel), but kept small enough that the grid has >= 2 tiles so
    # both v7x TensorCores get work on medium batches.
    TB = max(8, min(block_b, _round_up(pl.cdiv(B, 2), 8)))
    grid = (pl.cdiv(B, TB),)

    # Weights/biases are grid-invariant: constant index_map -> DMA'd once,
    # VMEM-resident across the whole batch loop.  Block == full array shape,
    # which is always a legal block shape.
    resident = lambda a: pl.BlockSpec(a.shape, lambda i: (0,) * a.ndim)

    return pl.pallas_call(
        _mlp_kernel,
        out_shape=jax.ShapeDtypeStruct((B, out_dim), jnp.float32),
        grid=grid,
        in_specs=[
            # x tile: full (unpadded) feature dim, ragged last batch tile OK.
            pl.BlockSpec((TB, in_dim), lambda i: (i, 0)),
            resident(prepared["w1"]), resident(prepared["b1"]),
            resident(prepared["w2"]), resident(prepared["b2"]),
            resident(prepared["w3"]), resident(prepared["b3"]),
        ],
        # Unpadded output: (TB, out_dim) with full last dim -> 16x fewer HBM
        # writeback bytes than a 128-lane-padded f32 slab.
        out_specs=pl.BlockSpec((TB, out_dim), lambda i: (i, 0)),
        compiler_params=pltpu.CompilerParams(
            dimension_semantics=("parallel",)),
    )(x, prepared["w1"], prepared["b1"], prepared["w2"], prepared["b2"],
      prepared["w3"], prepared["b3"])


def init_mlp_params(key, in_dim, out_dim, hidden_dim=64):
    """Matches the PyTorch module's init: xavier_uniform_ with
    gain = calculate_gain('relu') = sqrt(2), biases filled with 0.01.
    Weights stored pre-transposed to (fan_in, fan_out)."""
    gain = math.sqrt(2.0)

    def xavier(k, fan_in, fan_out):
        bound = gain * math.sqrt(6.0 / (fan_in + fan_out))
        return jax.random.uniform(k, (fan_in, fan_out), jnp.float32,
                                  minval=-bound, maxval=bound)

    k1, k2, k3 = jax.random.split(key, 3)
    return {
        "w1": xavier(k1, in_dim, hidden_dim),
        "b1": jnp.full((1, hidden_dim), 0.01, jnp.float32),
        "w2": xavier(k2, hidden_dim, hidden_dim),
        "b2": jnp.full((1, hidden_dim), 0.01, jnp.float32),
        "w3": xavier(k3, hidden_dim, out_dim),
        "b3": jnp.full((1, out_dim), 0.01, jnp.float32),
    }


def mlp_ref(x, params, compute_dtype=jnp.bfloat16):
    """Reference with the same bf16-operand / f32-accumulate numerics."""
    cd = compute_dtype
    h = jnp.dot(x.astype(cd), params["w1"].astype(cd),
                preferred_element_type=jnp.float32) + params["b1"]
    h = jnp.maximum(h, 0.0)
    h = jnp.dot(h.astype(cd), params["w2"].astype(cd),
                preferred_element_type=jnp.float32) + params["b2"]
    h = jnp.maximum(h, 0.0)
    return jnp.dot(h.astype(cd), params["w3"].astype(cd),
                   preferred_element_type=jnp.float32) + params["b3"]


if __name__ == "__main__":
    key = jax.random.PRNGKey(0)
    k_params, k_x = jax.random.split(key)

    batch, in_dim, hidden_dim, out_dim = 8, 16, 64, 8
    params = init_mlp_params(k_params, in_dim, out_dim, hidden_dim)
    prepared = prepare_params(params)
    x = jax.random.normal(k_x, (batch, in_dim), jnp.float32)

    out = mlp_forward(x, prepared)
    out = jax.block_until_ready(out)

    ref = mlp_ref(x, params)
    assert out.shape == (batch, out_dim)
    assert jnp.allclose(out, ref, atol=1e-3, rtol=1e-3), \
        f"max abs err {jnp.max(jnp.abs(out - ref))}"

    print("KERNEL_OK")
</pallas_src>

<mosaic_0001>
module attributes {stable_mosaic.version = 11 : i64} {
  func.func @_mlp_kernel(%arg0: i32, %arg1: memref<8x16xf32, #tpu.memory_space<vmem>>, %arg2: memref<16x64xbf16, #tpu.memory_space<vmem>>, %arg3: memref<1x64xf32, #tpu.memory_space<vmem>>, %arg4: memref<64x64xbf16, #tpu.memory_space<vmem>>, %arg5: memref<1x64xf32, #tpu.memory_space<vmem>>, %arg6: memref<64x8xbf16, #tpu.memory_space<vmem>>, %arg7: memref<1x8xf32, #tpu.memory_space<vmem>>, %arg8: memref<8x8xf32, #tpu.memory_space<vmem>>) attributes {dimension_semantics = [#tpu.dimension_semantics<parallel>], iteration_bounds = array<i64: 1>, scalar_prefetch = 0 : i64, scratch_operands = 0 : i64, tpu.core_type = #tpu.core_type<tc>, window_params = [{transform_indices = @transform_0, window_bounds = array<i64: 8, 16>}, {pipeline_mode = #tpu.pipeline_mode<synchronous>, transform_indices = @transform_1, window_bounds = array<i64: 16, 64>}, {pipeline_mode = #tpu.pipeline_mode<synchronous>, transform_indices = @transform_2, window_bounds = array<i64: 1, 64>}, {pipeline_mode = #tpu.pipeline_mode<synchronous>, transform_indices = @transform_3, window_bounds = array<i64: 64, 64>}, {pipeline_mode = #tpu.pipeline_mode<synchronous>, transform_indices = @transform_4, window_bounds = array<i64: 1, 64>}, {pipeline_mode = #tpu.pipeline_mode<synchronous>, transform_indices = @transform_5, window_bounds = array<i64: 64, 8>}, {pipeline_mode = #tpu.pipeline_mode<synchronous>, transform_indices = @transform_6, window_bounds = array<i64: 1, 8>}, {transform_indices = @transform_7, window_bounds = array<i64: 8, 8>}]} {
    %c0 = arith.constant 0 : index
    %c0_0 = arith.constant 0 : index
    %0 = vector.load %arg3[%c0, %c0_0] : memref<1x64xf32, #tpu.memory_space<vmem>>, vector<1x64xf32>
    %c0_1 = arith.constant 0 : index
    %c0_2 = arith.constant 0 : index
    %1 = vector.load %arg5[%c0_1, %c0_2] : memref<1x64xf32, #tpu.memory_space<vmem>>, vector<1x64xf32>
    %c0_3 = arith.constant 0 : index
    %c0_4 = arith.constant 0 : index
    %2 = vector.load %arg7[%c0_3, %c0_4] : memref<1x8xf32, #tpu.memory_space<vmem>>, vector<1x8xf32>
    %c0_5 = arith.constant 0 : index
    %c0_6 = arith.constant 0 : index
    %3 = vector.load %arg1[%c0_5, %c0_6] : memref<8x16xf32, #tpu.memory_space<vmem>>, vector<8x16xf32>
    %4 = arith.truncf %3 : vector<8x16xf32> to vector<8x16xbf16>
    %c0_7 = arith.constant 0 : index
    %c0_8 = arith.constant 0 : index
    %5 = vector.load %arg2[%c0_7, %c0_8] : memref<16x64xbf16, #tpu.memory_space<vmem>>, vector<16x64xbf16>
    %cst = arith.constant dense<0.000000e+00> : vector<8x64xf32>
    %6 = tpu.matmul %4, %5, %cst {dimension_numbers = #tpu.dot_dimension_numbers<[1], [0], [0], [1], [0, 0, 1, 1], [], []>} : vector<8x16xbf16>, vector<16x64xbf16>, vector<8x64xf32> -> vector<8x64xf32>
    %7 = vector.broadcast %0 : vector<1x64xf32> to vector<8x64xf32>
    %8 = arith.addf %6, %7 : vector<8x64xf32>
    %cst_9 = arith.constant 0.000000e+00 : f32
    %9 = vector.broadcast %cst_9 : f32 to vector<8x64xf32>
    %10 = arith.maximumf %8, %9 : vector<8x64xf32>
    %11 = arith.truncf %10 : vector<8x64xf32> to vector<8x64xbf16>
    %c0_10 = arith.constant 0 : index
    %c0_11 = arith.constant 0 : index
    %12 = vector.load %arg4[%c0_10, %c0_11] : memref<64x64xbf16, #tpu.memory_space<vmem>>, vector<64x64xbf16>
    %cst_12 = arith.constant dense<0.000000e+00> : vector<8x64xf32>
    %13 = tpu.matmul %11, %12, %cst_12 {dimension_numbers = #tpu.dot_dimension_numbers<[1], [0], [0], [1], [0, 0, 1, 1], [], []>} : vector<8x64xbf16>, vector<64x64xbf16>, vector<8x64xf32> -> vector<8x64xf32>
    %14 = vector.broadcast %1 : vector<1x64xf32> to vector<8x64xf32>
    %15 = arith.addf %13, %14 : vector<8x64xf32>
    %cst_13 = arith.constant 0.000000e+00 : f32
    %16 = vector.broadcast %cst_13 : f32 to vector<8x64xf32>
    %17 = arith.maximumf %15, %16 : vector<8x64xf32>
    %18 = arith.truncf %17 : vector<8x64xf32> to vector<8x64xbf16>
    %c0_14 = arith.constant 0 : index
    %c0_15 = arith.constant 0 : index
    %19 = vector.load %arg6[%c0_14, %c0_15] : memref<64x8xbf16, #tpu.memory_space<vmem>>, vector<64x8xbf16>
    %cst_16 = arith.constant dense<0.000000e+00> : vector<8x8xf32>
    %20 = tpu.matmul %18, %19, %cst_16 {dimension_numbers = #tpu.dot_dimension_numbers<[1], [0], [0], [1], [0, 0, 1, 1], [], []>} : vector<8x64xbf16>, vector<64x8xbf16>, vector<8x8xf32> -> vector<8x8xf32>
    %21 = vector.broadcast %2 : vector<1x8xf32> to vector<8x8xf32>
    %22 = arith.addf %20, %21 : vector<8x8xf32>
    %c0_17 = arith.constant 0 : index
    %c0_18 = arith.constant 0 : index
    %23 = vector.load %arg8[%c0_17, %c0_18] : memref<8x8xf32, #tpu.memory_space<vmem>>, vector<8x8xf32>
    tpu.vector_store %arg8[%c0_17, %c0_18], %22 {strides = array<i32>} : memref<8x8xf32, #tpu.memory_space<vmem>>, vector<8x8xf32>,
    return
  }
  func.func @transform_0(%arg0: i32) -> (i32, i32) {
    %c0_i32 = arith.constant 0 : i32
    %c0_i32_0 = arith.constant 0 : i32
    return %arg0, %c0_i32 : i32, i32
  }
  func.func @transform_1(%arg0: i32) -> (i32, i32) {
    %c0_i32 = arith.constant 0 : i32
    %c0_i32_0 = arith.constant 0 : i32
    %c0_i32_1 = arith.constant 0 : i32
    return %c0_i32, %c0_i32_0 : i32, i32
  }
  func.func @transform_2(%arg0: i32) -> (i32, i32) {
    %c0_i32 = arith.constant 0 : i32
    %c0_i32_0 = arith.constant 0 : i32
    %c0_i32_1 = arith.constant 0 : i32
    return %c0_i32, %c0_i32_0 : i32, i32
  }
  func.func @transform_3(%arg0: i32) -> (i32, i32) {
    %c0_i32 = arith.constant 0 : i32
    %c0_i32_0 = arith.constant 0 : i32
    %c0_i32_1 = arith.constant 0 : i32
    return %c0_i32, %c0_i32_0 : i32, i32
  }
  func.func @transform_4(%arg0: i32) -> (i32, i32) {
    %c0_i32 = arith.constant 0 : i32
    %c0_i32_0 = arith.constant 0 : i32
    %c0_i32_1 = arith.constant 0 : i32
    return %c0_i32, %c0_i32_0 : i32, i32
  }
  func.func @transform_5(%arg0: i32) -> (i32, i32) {
    %c0_i32 = arith.constant 0 : i32
    %c0_i32_0 = arith.constant 0 : i32
    %c0_i32_1 = arith.constant 0 : i32
    return %c0_i32, %c0_i32_0 : i32, i32
  }
  func.func @transform_6(%arg0: i32) -> (i32, i32) {
    %c0_i32 = arith.constant 0 : i32
    %c0_i32_0 = arith.constant 0 : i32
    %c0_i32_1 = arith.constant 0 : i32
    return %c0_i32, %c0_i32_0 : i32, i32
  }
  func.func @transform_7(%arg0: i32) -> (i32, i32) {
    %c0_i32 = arith.constant 0 : i32
    %c0_i32_0 = arith.constant 0 : i32
    return %arg0, %c0_i32 : i32, i32
  }
}

</mosaic_0001>

<bundles_post_ra>
// kernel: tpu_custom_call.1
= control target key start
LH: loop header
LB: loop body
LE: loop exit
PB: predicated region body
PF: predicated region fallthrough
CT: control target
= control target key end

     0   :  { %12 = vsyncpa [#allocation3], 0  ;;  %s532_s0 = inlined_call_operand.vmem [shape: f32[8,16], index: 0, kind: input, shape index: {}]   ;;  %s533_s1 = inlined_call_operand.hbm [shape: bf16[16,64], index: 1, kind: input, shape index: {}]   ;;  %s534_s2 = inlined_call_operand.vmem [shape: f32[1,64], index: 2, kind: input, shape index: {}]   ;;  %s535_s3 = inlined_call_operand.vmem [shape: bf16[64,64], index: 3, kind: input, shape index: {}]   ;;  %s536_s4 = inlined_call_operand.hbm [shape: f32[1,64], index: 4, kind: input, shape index: {}]   ;;  %s537_s5 = inlined_call_operand.vmem [shape: bf16[64,8], index: 5, kind: input, shape index: {}]   ;;  %s538_s6 = inlined_call_operand.vmem [shape: f32[1,8], index: 6, kind: input, shape index: {}]   ;;  %s539_s7 = inlined_call_operand.hbm [shape: f32[8,8], index: 7, kind: output, shape index: {}]  }
   0x1   :  { %13 = vsyncpa [#allocation6], 0 }
   0x2   :  { %14 = vsyncpa [#allocation4], 0  ;;  %s441_s24 = smov [#allocation2]  }
   0x3   :  { %s22_s25 = sshll.u32 %s441_s24, 4  ;;  %s23_s25 = int_to_ptr.vmem [resolvable:$true] %s22_s25 }
   0x4   :  { %s383_s26 = scalar_lea.vmem %s23_s25, 128  ;;  %p388_p1 = scmp.lt.s32.totalorder %s23_s25, %s23_s25 }
   0x5   :  { %p384_p0 = scmp.ne.s32.totalorder %s23_s25, %s383_s26  ;;  %p389_p2 = scmp.lt.s32.totalorder %s383_s26, %s383_s26 }
   0x7   :  { %p390_p3 = por %p389_p2, %p388_p1 }
   0x9   :  { %p391_p4 = pnand %p390_p3, %p384_p0 }
   0xb   :  { %394 = shalt.err (!%p391_p4)
}
   0xc   :  { %s442_s27 = smov 64   ;;  %s443_s28 = smov 4  }
   0xd   :  { %28 = dma.hbm_to_vmem [thread:$0]  %s533_s1, 128, %s23_s25, [#allocation3], %s442_s27, %s442_s27, %s443_s28  }
   0xe   :  { %s444_s8 = smov [#allocation5]  }
   0xf   :  { %s39_s9 = sshll.u32 %s444_s8, 4  ;;  %s40_s9 = int_to_ptr.vmem [resolvable:$true] %s39_s9 }
  0x10   :  { %s403_s10 = scalar_lea.vmem %s40_s9, 16  ;;  %s407_s11 = scalar_lea.vmem %s40_s9, 32 }
  0x11   :  { %p404_p5 = scmp.ne.s32.totalorder %s40_s9, %s403_s10  ;;  %p408_p6 = scmp.lt.s32.totalorder %s40_s9, %s40_s9 }
  0x12   :  { %p409_p7 = scmp.lt.s32.totalorder %s407_s11, %s403_s10 }
  0x14   :  { %p410_p8 = por %p409_p7, %p408_p6 }
  0x16   :  { %p411_p9 = pnand %p410_p8, %p404_p5 }
  0x18   :  { %414 = shalt.err (!%p411_p9)
}
  0x19   :  { %42 = dma.hbm_to_vmem [thread:$0]  %s536_s4, 16, %s40_s9, [#allocation6]  }
  0x1a   :  { %435 = dma.done.wait [#allocation3], 128  }
  0x1b   :  { %436 = vsyncadd [#allocation3], 4294967168 }
  0x1c   :  { %437 = dma.done.wait [#allocation6], 16  }
  0x1d   :  { %438 = vsyncadd [#allocation6], 4294967280  ;;  %v445_v0 = vmov 0.0   ;;  %vm446_vm0 = vmmov 0   ;;  %v366_v1 = vld [vmem:[#allocation2] sm:$0xff]   ;;  %vm73_vm1 = vcmask 130048  }
  0x1e   :  { %329 = vmatprep.subr.bf16.mxu0 %v445_v0  ;;  %331 = vmatprep.mubr.msk.bf16.mxu0 %vm446_vm0, %v445_v0  ;;  %v57_v2 = vld [vmem:[%s532_s0] sm:$0xff]  ;;  %v367_v4 = vld [vmem:[%s535_s3 + $0x18] sm:$0xff]   ;;  %v368_v5 = vld [vmem:[%s535_s3 + $0x10] sm:$0xff]   ;;  %vm157_vm2 = vcmask 523264   ;;  %s447_s8 = smov [#allocation7]   ;;  %vm284_vm3 = vcmask 64512  }
  0x1f   :  { %335 = vmatprep.subr.bf16.mxu1 %v445_v0  ;;  %343 = vmatprep.mubr.msk.bf16.mxu1 %vm446_vm0, %v445_v0  ;;  %v58_v3 = vpack.c.bf16 %v57_v2, %v57_v2  ;;  %v369_v6 = vld [vmem:[%s535_s3 + $0x8] sm:$0xff]   ;;  %v370_v7 = vld [vmem:[%s535_s3] sm:$0xff]   ;;  %v371_v8 = vld [vmem:[%s537_s5 + $0x18] sm:$0xff]   ;;  %s292_s9 = sshll.u32 %s447_s8, 4  ;;  %s293_s9 = int_to_ptr.vmem [resolvable:$true] %s292_s9 }
  0x20   :  { %330 = vmatpush3.bf16.msra.mxu0 %v366_v1  ;;  %336 = vmatpush3.bf16.msra.mxu1 %v367_v4  ;;  %v372_v9 = vld [vmem:[%s537_s5 + $0x10] sm:$0xff]   ;;  %v302_v10 = vld [vmem:[%s534_s2] ss:$0 sm:$0xff]  ;;  %v373_v18 = vld [vmem:[%s537_s5 + $0x8] sm:$0xff]   ;;  %p420_p11 = scmp.lt.s32.totalorder %s293_s9, %s293_s9 }
  0x21   :  { %347 = vmatprep.subr.bf16.mxu0 %v445_v0  ;;  %337 = vmatprep.subr.bf16.mxu1 %v445_v0  ;;  %v374_v19 = vld [vmem:[%s537_s5] sm:$0xff]   ;;  %v305_v20 = vld [vmem:[#allocation5] ss:$0 sm:$0xff]  ;;  %s415_s5 = scalar_lea.vmem %s293_s9, 128 }
  0x22   :  { %v311_v28 = vld [vmem:[%s538_s6] ss:$0 sm:$0xff]  ;;  %p416_p10 = scmp.ne.s32.totalorder %s293_s9, %s415_s5  ;;  %p421_p12 = scmp.lt.s32.totalorder %s415_s5, %s415_s5 }
  0x23   :  { %332 = vmatmul.mubr.msk.bf16.vlgmr.msra.gmra.mxu0 %vm73_vm1, %v58_v3 }
  0x24   :  { %355 = vmatprep.mubr.msk.bf16.mxu0 %vm446_vm0, %v445_v0  ;;  %338 = vmatpush3.bf16.msra.mxu1 %v368_v5  ;;  %p422_p13 = por %p421_p12, %p420_p11 }
  0x25   :  { %339 = vmatprep.subr.bf16.mxu1 %v445_v0  ;;  %348 = vmatpush3.bf16.msra.mxu0 %v371_v8 }
  0x26   :  { %349 = vmatprep.subr.bf16.mxu0 %v445_v0  ;;  %p423_p0 = pnand %p422_p13, %p416_p10 }
  0x28   :  { %340 = vmatpush3.bf16.msra.mxu1 %v369_v6 }
  0x29   :  { %341 = vmatprep.subr.bf16.mxu1 %v445_v0  ;;  %350 = vmatpush3.bf16.msra.mxu0 %v372_v9 }
  0x2a   :  { %351 = vmatprep.subr.bf16.mxu0 %v445_v0 }
  0x2c   :  { %342 = vmatpush3.bf16.msra.mxu1 %v370_v7 }
  0x2d   :  { %352 = vmatpush3.bf16.msra.mxu0 %v373_v18 }
  0x2e   :  { %353 = vmatprep.subr.bf16.mxu0 %v445_v0 }
  0x31   :  { %354 = vmatpush3.bf16.msra.mxu0 %v374_v19 }
  0xe3   :  { %v111_v11 = vpop.f32.mrf.mxu0 }
  0xe4   :  { %v112_v12 = vadd.f32 %v302_v10, %v111_v11 }
  0xe5   :  { %v333_v13 = vpop.f32.mrf.mxu0 }
  0xe6   :  { %v117_v14 = vmax.f32 %v112_v12, 0.0 }
  0xe7   :  { %v114_v15 = vpop.f32.mrf.mxu0 }
  0xe8   :  { %v118_v16 = vpack.c.bf16 %v117_v14, %v117_v14 }
  0xe9   :  { %v334_v17 = vpop.f32.mrf.mxu0 }
  0xea   :  { %344 = vmatmul.mubr.msk.bf16.vlgmr.msra.gmra.mxu1 %vm157_vm2, %v118_v16 }
 0x1aa   :  { %v195_v21 = vpop.f32.mrf.mxu1 }
 0x1ab   :  { %v196_v22 = vadd.f32 %v305_v20, %v195_v21 }
 0x1ac   :  { %v345_v23 = vpop.f32.mrf.mxu1 }
 0x1ad   :  { %v201_v24 = vmax.f32 %v196_v22, 0.0 }
 0x1ae   :  { %v198_v25 = vpop.f32.mrf.mxu1 }
 0x1af   :  { %v202_v26 = vpack.c.bf16 %v201_v24, %v201_v24 }
 0x1b0   :  { %v346_v27 = vpop.f32.mrf.mxu1 }
 0x1b1   :  { %356 = vmatmul.mubr.msk.bf16.vlgmr.msra.gmra.mxu0 %vm157_vm2, %v202_v26 }
 0x271   :  { %v278_v29 = vpop.f32.mrf.mxu0 }
 0x272   :  { %v279_v30 = vadd.f32 %v311_v28, %v278_v29 }
 0x273   :  { %v357_v31 = vpop.f32.mrf.mxu0 }
 0x274   :  { %285 = vst.msk [vmem:[#allocation7] sm:$0xff] %vm284_vm3, %v279_v30 }
 0x275   :  { %v281_v32 = vpop.f32.mrf.mxu0 }
 0x276   :  { %426 = shalt.err (!%p423_p0)
}
 0x277   :  { %295 = dma.vmem_to_hbm [thread:$0]  %s293_s9, 128, %s539_s7, [#allocation4]   ;;  %v358_v33 = vpop.f32.mrf.mxu0 }
 0x278   :  { %439 = dma.done.wait [#allocation4], 128  }
 0x279   :  { %440 = vsyncadd [#allocation4], 4294967168 }
 0x27a   :  { %299 = vsyncpa [#allocation3], 1 }
 0x27b   :  { %300 = vsyncpa [#allocation6], 1 }
 0x27c   :  { %301 = vsyncpa [#allocation4], 1 }

</bundles_post_ra>
